<compile_context>
chip_gen: v7x
topology: tpu7x:2x2x1
jax: 0.10.0
libtpu: 0.0.40
codegen_flags: <defaults>
</compile_context>

<pallas_src>
import jax
import jax.numpy as jnp
from jax.experimental import pallas as pl
from jax.experimental.pallas import tpu as pltpu


def _rotary_half_kernel(inv_freq_ref, cos_ref, sin_ref):
    """Write cos/sin of one (D/2, TILE_S) tile of the half rotary table.

    inv_freq_ref: (D/2, 1) f32  -- rotary inverse frequencies (sublane axis)
    cos_ref/sin_ref: (D/2, TILE_S) f32 -- positions on the lane axis
    """
    half, tile_s = cos_ref.shape
    seq_off = pl.program_id(0) * tile_s
    # Positions generated in-kernel (free scalar/VPU work) -> no (S,1) input.
    pos = (
        jax.lax.broadcasted_iota(jnp.int32, (half, tile_s), dimension=1) + seq_off
    ).astype(jnp.float32)
    freqs = inv_freq_ref[...] * pos          # broadcast along lanes -> (D/2, TILE_S)
    cos_ref[...] = jnp.cos(freqs)            # transcendentals only on the half table
    sin_ref[...] = jnp.sin(freqs)


def rotary_half_tables(max_seq_len: int, dim: int, base: float):
    """Return (D/2, S) cos/sin half-tables computed by a seq-tiled Pallas kernel."""
    half = dim // 2
    # Lane-dense tiling over the sequence axis (positions live on lanes).
    s_pad = pl.cdiv(max_seq_len, 128) * 128
    tile_s = min(256, s_pad)                       # small EUP-bound tiles; pipelines fine
    s_total = pl.cdiv(max_seq_len, tile_s) * tile_s

    inv_freq = 1.0 / (base ** (jnp.arange(0, dim, 2, dtype=jnp.float32) / dim))
    inv_freq = inv_freq.reshape(half, 1)

    cos_t, sin_t = pl.pallas_call(
        _rotary_half_kernel,
        out_shape=(
            jax.ShapeDtypeStruct((half, s_total), jnp.float32),
            jax.ShapeDtypeStruct((half, s_total), jnp.float32),
        ),
        grid=(s_total // tile_s,),
        in_specs=[pl.BlockSpec((half, 1), lambda i: (0, 0))],
        out_specs=(
            pl.BlockSpec((half, tile_s), lambda i: (0, i)),
            pl.BlockSpec((half, tile_s), lambda i: (0, i)),
        ),
        compiler_params=pltpu.CompilerParams(dimension_semantics=("parallel",)),
    )(inv_freq)
    # Drop the lane padding beyond max_seq_len.
    return cos_t[:, :max_seq_len], sin_t[:, :max_seq_len]


class Rotary:
    """JAX/Pallas port of the PyTorch Rotary module (forward semantics kept exact)."""

    def __init__(self, dim, base=10000, max_seq_len=512):
        self.dim = dim
        self.base = base
        self.max_seq_len = max_seq_len
        self.precompute()

    def precompute(self):
        half_cos, half_sin = rotary_half_tables(
            self.max_seq_len, self.dim, float(self.base)
        )
        # emb = torch.cat((freqs, freqs), -1): duplicate the half-table along
        # the rotary dim, then transpose back to (S, D).
        cos = jnp.concatenate([half_cos, half_cos], axis=0).T   # (S, D)
        sin = jnp.concatenate([half_sin, half_sin], axis=0).T   # (S, D)
        ones = jnp.ones_like(cos)
        zeros = jnp.zeros_like(sin)
        # repeat(1, 1, 3, 1, 1) with qkv channel 2 filled with cos=1 / sin=0.
        # TODO(synk): this cache assembly could be fused into the kernel
        # (channel-2 constants written directly), but it is precompute-only.
        self.cos_cached = jnp.stack([cos, cos, ones], axis=1)[None, :, :, None, :]
        self.sin_cached = jnp.stack([sin, sin, zeros], axis=1)[None, :, :, None, :]

    def __call__(self, x, seq_dim=1):
        seq_len = x.shape[seq_dim]
        # NOTE: exactly mirrors the PyTorch code — the slice `[:, :, :seq_len]`
        # is applied on axis 2 (the size-3 qkv axis), not on the seq axis.
        return (self.cos_cached[:, :, :seq_len], self.sin_cached[:, :, :seq_len])


if __name__ == "__main__":
    dim = 32
    max_seq_len = 64
    base = 10000

    rot = Rotary(dim, base=base, max_seq_len=max_seq_len)

    # x layout: (batch, seq, 3=qkv, heads, head_dim) — forward only uses x.shape[1].
    key = jax.random.PRNGKey(0)
    x = jax.random.normal(key, (2, 8, 3, 4, dim), dtype=jnp.float32)

    cos_out, sin_out = rot(x)
    cos_out = jax.block_until_ready(cos_out)
    sin_out = jax.block_until_ready(sin_out)

    # Pure-JAX reference check of the kernel-produced tables.
    inv_freq_ref = 1.0 / (base ** (jnp.arange(0, dim, 2, dtype=jnp.float32) / dim))
    t_ref = jnp.arange(max_seq_len, dtype=jnp.float32)
    freqs_ref = jnp.einsum("i,j->ij", t_ref, inv_freq_ref)
    emb_ref = jnp.concatenate([freqs_ref, freqs_ref], axis=-1)
    cos_ref5 = jnp.broadcast_to(
        jnp.cos(emb_ref)[None, :, None, None, :], (1, max_seq_len, 3, 1, dim)
    )
    sin_ref5 = jnp.broadcast_to(
        jnp.sin(emb_ref)[None, :, None, None, :], (1, max_seq_len, 3, 1, dim)
    )
    cos_ref5 = cos_ref5.at[:, :, 2].set(1.0)
    sin_ref5 = sin_ref5.at[:, :, 2].set(0.0)
    seq_len = x.shape[1]
    cos_ref_out = cos_ref5[:, :, :seq_len]
    sin_ref_out = sin_ref5[:, :, :seq_len]

    assert cos_out.shape == cos_ref_out.shape, (cos_out.shape, cos_ref_out.shape)
    assert sin_out.shape == sin_ref_out.shape, (sin_out.shape, sin_ref_out.shape)
    assert jnp.allclose(cos_out, cos_ref_out, atol=1e-5)
    assert jnp.allclose(sin_out, sin_ref_out, atol=1e-5)

    print("KERNEL_OK")
</pallas_src>

<mosaic_0001>
module attributes {stable_mosaic.version = 11 : i64} {
  func.func @_rotary_half_kernel(%arg0: i32, %arg1: memref<16x1xf32, #tpu.memory_space<vmem>>, %arg2: memref<16x128xf32, #tpu.memory_space<vmem>>, %arg3: memref<16x128xf32, #tpu.memory_space<vmem>>) attributes {dimension_semantics = [#tpu.dimension_semantics<parallel>], iteration_bounds = array<i64: 1>, scalar_prefetch = 0 : i64, scratch_operands = 0 : i64, tpu.core_type = #tpu.core_type<tc>, window_params = [{pipeline_mode = #tpu.pipeline_mode<synchronous>, transform_indices = @transform_0, window_bounds = array<i64: 16, 1>}, {transform_indices = @transform_1, window_bounds = array<i64: 16, 128>}, {transform_indices = @transform_2, window_bounds = array<i64: 16, 128>}]} {
    %c128_i32 = arith.constant 128 : i32
    %0 = arith.muli %arg0, %c128_i32 : i32
    %1 = tpu.iota {dimensions = array<i32: 1>} : vector<16x128xi32>
    %2 = vector.broadcast %0 : i32 to vector<16x128xi32>
    %3 = arith.addi %1, %2 : vector<16x128xi32>
    %4 = arith.sitofp %3 : vector<16x128xi32> to vector<16x128xf32>
    %c0 = arith.constant 0 : index
    %c0_0 = arith.constant 0 : index
    %5 = vector.load %arg1[%c0, %c0_0] : memref<16x1xf32, #tpu.memory_space<vmem>>, vector<16x1xf32>
    %6 = vector.broadcast %5 : vector<16x1xf32> to vector<16x128xf32>
    %7 = arith.mulf %6, %4 : vector<16x128xf32>
    %8 = math.cos %7 : vector<16x128xf32>
    %c0_1 = arith.constant 0 : index
    %c0_2 = arith.constant 0 : index
    %9 = vector.load %arg2[%c0_1, %c0_2] : memref<16x128xf32, #tpu.memory_space<vmem>>, vector<16x128xf32>
    tpu.vector_store %arg2[%c0_1, %c0_2], %8 {strides = array<i32>} : memref<16x128xf32, #tpu.memory_space<vmem>>, vector<16x128xf32>,
    %10 = math.sin %7 : vector<16x128xf32>
    %c0_3 = arith.constant 0 : index
    %c0_4 = arith.constant 0 : index
    %11 = vector.load %arg3[%c0_3, %c0_4] : memref<16x128xf32, #tpu.memory_space<vmem>>, vector<16x128xf32>
    tpu.vector_store %arg3[%c0_3, %c0_4], %10 {strides = array<i32>} : memref<16x128xf32, #tpu.memory_space<vmem>>, vector<16x128xf32>,
    return
  }
  func.func @transform_0(%arg0: i32) -> (i32, i32) {
    %c0_i32 = arith.constant 0 : i32
    %c0_i32_0 = arith.constant 0 : i32
    %c0_i32_1 = arith.constant 0 : i32
    return %c0_i32, %c0_i32_0 : i32, i32
  }
  func.func @transform_1(%arg0: i32) -> (i32, i32) {
    %c0_i32 = arith.constant 0 : i32
    %c0_i32_0 = arith.constant 0 : i32
    return %c0_i32, %arg0 : i32, i32
  }
  func.func @transform_2(%arg0: i32) -> (i32, i32) {
    %c0_i32 = arith.constant 0 : i32
    %c0_i32_0 = arith.constant 0 : i32
    return %c0_i32, %arg0 : i32, i32
  }
}

</mosaic_0001>

<bundles_post_ra>
// kernel: tpu_custom_call.1
= control target key start
LH: loop header
LB: loop body
LE: loop exit
PB: predicated region body
PF: predicated region fallthrough
CT: control target
= control target key end

     0   :  { %8 = vsyncpa [#allocation3], 0  ;;  %v574_v1 = vmov 0   ;;  %s697_s0 = inlined_call_operand.vmem [shape: f32[16,1], index: 0, kind: input, shape index: {}]   ;;  %s698_s1 = inlined_call_operand.hbm [shape: f32[16,128], index: 1, kind: output, shape index: {0}]   ;;  %s699_s2 = inlined_call_operand.hbm [shape: f32[16,128], index: 2, kind: output, shape index: {1}]  }
   0x1   :  { %v18_v0 = vld [vmem:[%s697_s0] sm:$0xff]  ;;  %517 = vset.pattern.permute.xlu0 %v574_v1  ;;  %v19_v2 = vld [vmem:[%s697_s0 + $0x8] sm:$0xff] }
   0x2   :  { %22 = vperm.xlu0 %517, %v18_v0  }
   0x3   :  { %9 = vsyncpa [#allocation5], 0  ;;  %v13_v3 = vlaneseq  ;;  %v575_v26 = vmov 683565275   ;;  %v576_v30 = vmov 2475754826  }
   0x4   :  { %v577_v32 = vmov 2131351028   ;;  %v578_v34 = vmov 2102212464   ;;  %v579_v36 = vmov 920167782  }
   0x5   :  { %v14_v4 = vand.u32 127, %v13_v3  ;;  %v580_v43 = vmov 1326507024   ;;  %s581_s0 = smov [#allocation2]   ;;  %s582_s14 = smov [#allocation4]  }
   0x6   :  { %27 = vperm.xlu0 %517, %v19_v2   ;;  %s455_s13 = sshll.u32 %s581_s0, 4  ;;  %s467_s15 = sshll.u32 %s582_s14, 4  ;;  %s456_s13 = int_to_ptr.vmem [resolvable:$true] %s455_s13  ;;  %s666_s15 = int_to_ptr.vmem [resolvable:$true] %s467_s15 }
   0x7   :  { %v17_v5 = vcvt.s32.f32 %v14_v4  ;;  %s526_s16 = scalar_lea.vmem %s456_s13, 256  ;;  %p531_p1 = scmp.lt.s32.totalorder %s456_s13, %s456_s13 }
   0x8   :  { %p527_p0 = scmp.ne.s32.totalorder %s456_s13, %s526_s16  ;;  %p532_p2 = scmp.lt.s32.totalorder %s526_s16, %s526_s16 }
   0xa   :  { %p533_p3 = por %p532_p2, %p531_p1 }
   0xc   :  { %p534_p4 = pnand %p533_p3, %p527_p0 }
  0x81   :  { %v23_v6 = vpop.permute.xlu0 %22 }
  0x82   :  { %v606_v7 = vmul.f32 %v23_v6, %v17_v5 }
  0x84   :  { %v32_v8 = vand.u32 2147483647, %v606_v7  ;;  %v35_v9 = vand.u32 2139095040, %v606_v7  ;;  %vm34_vm14 = vcmp.lt.s32.totalorder %v606_v7, 0 }
  0x85   :  { %v28_v10 = vpop.permute.xlu0 %27 }
  0x86   :  { %v36_v11 = vshrl.u32 %v35_v9, 23  ;;  %v610_v12 = vmul.f32 %v28_v10, %v17_v5  ;;  %v39_v13 = vand.u32 8388607, %v32_v8  ;;  %vm33_vm15 = vcmp.le.f32.partialorder %v32_v8, 0.7853982 }
  0x88   :  { %v482_v14 = vadd.s32 4294967169, %v36_v11  ;;  %v138_v15 = vand.u32 2139095040, %v610_v12  ;;  %v40_v17 = vor.u32 8388608, %v39_v13  ;;  %v135_v19 = vand.u32 2147483647, %v610_v12 }
  0x8a   :  { %v42_v16 = vadd.s32 1, %v482_v14  ;;  %v139_v18 = vshrl.u32 %v138_v15, 23  ;;  %v616_v24 = vshll.u32 %v40_v17, 8  ;;  %v142_v28 = vand.u32 8388607, %v135_v19 }
  0x8c   :  { %vm43_vm0 = vcmp.gt.s32.totalorder %v42_v16, 0  ;;  %v486_v21 = vadd.s32 4294967169, %v139_v18  ;;  %v143_v58 = vor.u32 8388608, %v142_v28 }
  0x8d   :  { %v44_v20 = vsel %vm43_vm0, %v42_v16, 0  ;;  %vm137_vm0 = vcmp.lt.s32.totalorder %v610_v12, 0 }
  0x8e   :  { %v45_v22 = vshrl.u32 %v44_v20, 5  ;;  %v46_v23 = vand.u32 31, %v44_v20  ;;  %v145_v29 = vadd.s32 1, %v486_v21  ;;  %v183_v9 = vshll.u32 %v143_v58, 8 }
  0x90   :  { %v47_v25 = vsub.s32 32, %v46_v23  ;;  %v49_v27 = vshll.u32 %v575_v26, %v46_v23  ;;  %v52_v31 = vshll.u32 %v576_v30, %v46_v23  ;;  %v55_v33 = vshll.u32 %v577_v32, %v46_v23 }
  0x91   :  { %v58_v35 = vshll.u32 %v578_v34, %v46_v23  ;;  %v61_v37 = vshll.u32 %v579_v36, %v46_v23  ;;  %vm64_vm1 = vcmp.lt.s32.totalorder %v45_v22, 1  ;;  %vm66_vm2 = vcmp.lt.s32.totalorder %v45_v22, 3 }
  0x92   :  { %v50_v38 = vshrl.u32 %v576_v30, %v47_v25  ;;  %v53_v39 = vshrl.u32 %v577_v32, %v47_v25  ;;  %v56_v40 = vshrl.u32 %v578_v34, %v47_v25  ;;  %v48_v41 = vshrl.u32 %v575_v26, %v47_v25 }
  0x93   :  { %v59_v42 = vshrl.u32 %v579_v36, %v47_v25  ;;  %v62_v44 = vshrl.u32 %v580_v43, %v47_v25  ;;  %vm146_vm3 = vcmp.gt.s32.totalorder %v145_v29, 0  ;;  %vm67_vm4 = vcmp.lt.s32.totalorder %v45_v22, 4 }
  0x94   :  { %v51_v45 = vor.u32 %v50_v38, %v49_v27  ;;  %v54_v46 = vor.u32 %v53_v39, %v52_v31  ;;  %v57_v47 = vor.u32 %v56_v40, %v55_v33  ;;  %v147_v50 = vsel %vm146_vm3, %v145_v29, 0 }
  0x95   :  { %v60_v48 = vor.u32 %v59_v42, %v58_v35  ;;  %v63_v49 = vor.u32 %v62_v44, %v61_v37  ;;  %vm65_vm5 = vcmp.lt.s32.totalorder %v45_v22, 2  ;;  %v149_v61 = vand.u32 31, %v147_v50 }
  0x96   :  { %v68_v51 = vsel %vm64_vm1, %v48_v41, %v51_v45  ;;  %v69_v52 = vsel %vm67_vm4, %v57_v47, 2102212464  ;;  %v72_v53 = vsel %vm64_vm1, %v51_v45, %v54_v46  ;;  %v76_v54 = vsel %vm64_vm1, %v54_v46, %v57_v47 }
  0x97   :  { %v70_v55 = vsel %vm66_vm2, %v54_v46, %v69_v52  ;;  %v73_v56 = vsel %vm67_vm4, %v60_v48, 920167782  ;;  %v77_v57 = vsel %vm67_vm4, %v63_v49, 1326507024  ;;  %v148_v5 = vshrl.u32 %v147_v50, 5 }
  0x98   :  { %v74_v59 = vsel %vm66_vm2, %v57_v47, %v73_v56  ;;  %v78_v60 = vsel %vm66_vm2, %v60_v48, %v77_v57  ;;  %v71_v62 = vsel %vm65_vm5, %v68_v51, %v70_v55  ;;  %v150_v6 = vsub.s32 32, %v149_v61 }
  0x99   :  { %v75_v63 = vsel %vm65_vm5, %v72_v53, %v74_v59  ;;  %v79_v0 = vsel %vm65_vm5, %v76_v54, %v78_v60  ;;  %v87_v10 = vmul.u32 %v616_v24, %v71_v62  ;;  %v152_v11 = vshll.u32 %v575_v26, %v149_v61 }
  0x9a   :  { %v629_v1 = vmul.u32.u64.low %v616_v24, %v79_v0  ;;  %v630_v2 = vmul.u32.u64.high %v616_v24, %v79_v0, %v629_v1  ;;  %v633_v3 = vmul.u32.u64.low %v616_v24, %v75_v63  ;;  %v634_v4 = vmul.u32.u64.high %v616_v24, %v75_v63, %v633_v3 }
  0x9b   :  { %v155_v13 = vshll.u32 %v576_v30, %v149_v61  ;;  %v158_v14 = vshll.u32 %v577_v32, %v149_v61  ;;  %v153_v15 = vshrl.u32 %v576_v30, %v150_v6  ;;  %v156_v16 = vshrl.u32 %v577_v32, %v150_v6 }
  0x9c   :  { %v159_v17 = vshrl.u32 %v578_v34, %v150_v6  ;;  %v161_v18 = vshll.u32 %v578_v34, %v149_v61  ;;  %vm89_vm6 = vc.u32 %v630_v2, %v633_v3  ;;  %v90_v20 = vadd.s32 1, %v634_v4 }
  0x9d   :  { %v162_v21 = vshrl.u32 %v579_v36, %v150_v6  ;;  %v164_v22 = vshll.u32 %v579_v36, %v149_v61  ;;  %v154_v23 = vor.u32 %v153_v15, %v152_v11  ;;  %v157_v25 = vor.u32 %v156_v16, %v155_v13 }
  0x9e   :  { %v160_v27 = vor.u32 %v159_v17, %v158_v14  ;;  %v165_v28 = vshrl.u32 %v580_v43, %v150_v6  ;;  %v91_v24 = vsel %vm89_vm6, %v90_v20, %v634_v4  ;;  %vm167_vm7 = vcmp.lt.s32.totalorder %v148_v5, 1 }
  0x9f   :  { %v163_v29 = vor.u32 %v162_v21, %v161_v18  ;;  %vm170_vm8 = vcmp.lt.s32.totalorder %v148_v5, 4  ;;  %v92_v30 = vadd.s32 %v91_v24, %v87_v10  ;;  %vm169_vm9 = vcmp.lt.s32.totalorder %v148_v5, 3 }
  0xa0   :  { %v166_v31 = vor.u32 %v165_v28, %v164_v22  ;;  %v172_v32 = vsel %vm170_vm8, %v160_v27, 2102212464  ;;  %v151_v33 = vshrl.u32 %v575_v26, %v150_v6  ;;  %v175_v34 = vsel %vm167_vm7, %v154_v23, %v157_v25 }
  0xa1   :  { %v176_v35 = vsel %vm170_vm8, %v163_v29, 920167782  ;;  %v179_v37 = vsel %vm167_vm7, %v157_v25, %v160_v27  ;;  %v93_v38 = vadd.s32 536870912, %v92_v30  ;;  %vm168_vm10 = vcmp.lt.s32.totalorder %v148_v5, 2 }
  0xa2   :  { %v177_v36 = vsel %vm169_vm9, %v160_v27, %v176_v35  ;;  %v180_v39 = vsel %vm170_vm8, %v166_v31, 1326507024  ;;  %v171_v40 = vsel %vm167_vm7, %v151_v33, %v154_v23  ;;  %v173_v41 = vsel %vm169_vm9, %v157_v25, %v172_v32 }
  0xa3   :  { %v178_v42 = vsel %vm168_vm10, %v175_v34, %v177_v36  ;;  %v181_v43 = vsel %vm169_vm9, %v163_v29, %v180_v39  ;;  %v94_v44 = vshrl.u32 %v93_v38, 30  ;;  %v174_v50 = vsel %vm168_vm10, %v171_v40, %v173_v41 }
  0xa4   :  { %v182_v45 = vsel %vm168_vm10, %v179_v37, %v181_v43  ;;  %v644_v46 = vmul.u32.u64.low %v183_v9, %v178_v42  ;;  %v645_v47 = vmul.u32.u64.high %v183_v9, %v178_v42, %v644_v46  ;;  %v190_v53 = vmul.u32 %v183_v9, %v174_v50 }
  0xa5   :  { %v647_v48 = vmul.u32.u64.low %v183_v9, %v182_v45  ;;  %v648_v49 = vmul.u32.u64.high %v183_v9, %v182_v45, %v647_v48  ;;  %v95_v26 = vshll.u32 %v94_v44, 30  ;;  %v88_v1 = vadd.s32 %v633_v3, %v630_v2 }
  0xa6   :  { %v193_v52 = vadd.s32 1, %v645_v47  ;;  %v118_v23 = vsub.s32 4, %v94_v44  ;;  %vm136_vm1 = vcmp.le.f32.partialorder %v135_v19, 0.7853982  ;;  %vm124_vm8 = vweird.f32 %v606_v7 }
  0xa7   :  { %v96_v51 = vsub.s32 %v92_v30, %v95_v26  ;;  %vm192_vm11 = vc.u32 %v648_v49, %v644_v46  ;;  %v191_v2 = vadd.s32 %v644_v46, %v648_v49 }
  0xa8   :  { %v194_v55 = vsel %vm192_vm11, %v193_v52, %v645_v47  ;;  %v119_v32 = vsel %vm34_vm14, %v118_v23, %v94_v44 }
  0xa9   :  { %v98_v54 = vsub.s32 0, %v96_v51  ;;  %v195_v56 = vadd.s32 %v194_v55, %v190_v53  ;;  %v121_v38 = vsel %vm33_vm15, 0, %v119_v32 }
  0xaa   :  { %v333_v40 = vadd.s32 3, %v121_v38  ;;  %v125_v45 = vand.u32 3, %v121_v38 }
  0xab   :  { %v483_v57 = vmin.u32 %v98_v54, %v96_v51  ;;  %v196_v58 = vadd.s32 536870912, %v195_v56 }
  0xac   :  { %v334_v8 = vand.u32 3, %v333_v40  ;;  %vm130_vm2 = vcmp.eq.s32.totalorder %v125_v45, 2  ;;  %vm127_vm4 = vcmp.eq.s32.totalorder %v125_v45, 0  ;;  %vm126_vm6 = vcmp.lt.s32.totalorder %v125_v45, 2 }
  0xad   :  { %v100_v59 = vclz %v483_v57  ;;  %v197_v60 = vshrl.u32 %v196_v58, 30 }
  0xae   :  { %vm339_vm3 = vcmp.eq.s32.totalorder %v334_v8, 2  ;;  %vm336_vm5 = vcmp.eq.s32.totalorder %v334_v8, 0  ;;  %vm335_vm7 = vcmp.lt.s32.totalorder %v334_v8, 2 }
  0xaf   :  { %v484_v61 = vadd.s32 4294967294, %v100_v59  ;;  %v198_v62 = vshll.u32 %v197_v60, 30  ;;  %v221_v42 = vsub.s32 4, %v197_v60 }
  0xb1   :  { %vm485_vm12 = vcmp.lt.s32.totalorder %v484_v61, 0  ;;  %v199_v0 = vsub.s32 %v195_v56, %v198_v62  ;;  %v222_v46 = vsel %vm137_vm0, %v221_v42, %v197_v60 }
  0xb2   :  { %v103_v63 = vsel %vm485_vm12, 0, %v484_v61 }
  0xb3   :  { %v104_v4 = vsub.s32 32, %v103_v63  ;;  %v108_v5 = vsub.s32 4294967266, %v103_v63  ;;  %v201_v6 = vsub.s32 0, %v199_v0  ;;  %v105_v9 = vshll.u32 %v96_v51, %v103_v63 }
  0xb4   :  { %v224_v51 = vsel %vm136_vm1, 0, %v222_v46 }
  0xb5   :  { %v106_v10 = vshrl.u32 %v88_v1, %v104_v4  ;;  %v109_v11 = vadd.s32 127, %v108_v5  ;;  %v487_v13 = vmin.u32 %v201_v6, %v199_v0  ;;  %v437_v57 = vadd.s32 3, %v224_v51 }
  0xb6   :  { %v228_v60 = vand.u32 3, %v224_v51 }
  0xb7   :  { %v107_v14 = vor.u32 %v106_v10, %v105_v9  ;;  %v110_v15 = vshll.u32 %v109_v11, 23  ;;  %v203_v16 = vclz %v487_v13  ;;  %v438_v61 = vand.u32 3, %v437_v57 }
  0xb8   :  { %vm233_vm9 = vcmp.eq.s32.totalorder %v228_v60, 2  ;;  %vm230_vm11 = vcmp.eq.s32.totalorder %v228_v60, 0 }
  0xb9   :  { %v111_v17 = vor.u32 4788187, %v110_v15  ;;  %v488_v18 = vadd.s32 4294967294, %v203_v16  ;;  %v114_v21 = vcvt.s32.f32 %v107_v14  ;;  %vm443_vm10 = vcmp.eq.s32.totalorder %v438_v61, 2 }
  0xba   :  { %vm440_vm12 = vcmp.eq.s32.totalorder %v438_v61, 0 }
  0xbb   :  { %v112_v20 = vand.u32 2147483647, %v111_v17  ;;  %vm489_vm13 = vcmp.lt.s32.totalorder %v488_v18, 0 }
  0xbc   :  { %v206_v25 = vsel %vm489_vm13, 0, %v488_v18  ;;  %vm229_vm13 = vcmp.lt.s32.totalorder %v228_v60, 2 }
  0xbd   :  { %v115_v22 = vmul.f32 %v114_v21, %v112_v20  ;;  %v207_v3 = vsub.s32 32, %v206_v25  ;;  %v211_v27 = vsub.s32 4294967266, %v206_v25  ;;  %v208_v24 = vshll.u32 %v199_v0, %v206_v25 }
  0xbf   :  { %v116_v28 = vxor.u32 2147483648, %v115_v22  ;;  %v209_v29 = vshrl.u32 %v191_v2, %v207_v3  ;;  %v212_v30 = vadd.s32 127, %v211_v27 }
  0xc1   :  { %v117_v31 = vsel %vm34_vm14, %v116_v28, %v115_v22  ;;  %v210_v34 = vor.u32 %v209_v29, %v208_v24  ;;  %v213_v35 = vshll.u32 %v212_v30, 23  ;;  %vm439_vm14 = vcmp.lt.s32.totalorder %v438_v61, 2 }
  0xc2   :  { %v120_v33 = vsel %vm33_vm15, %v606_v7, %v117_v31  ;;  %vm227_vm15 = vweird.f32 %v610_v12 }
  0xc3   :  { %518 = vcosq.f32 %v120_v33  ;;  %v214_v37 = vor.u32 4788187, %v213_v35  ;;  %v217_v39 = vcvt.s32.f32 %v210_v34 }
  0xc4   :  { %520 = vsinq.f32 %v120_v33 }
  0xc5   :  { %v215_v36 = vand.u32 2147483647, %v214_v37 }
  0xc7   :  { %v218_v41 = vmul.f32 %v217_v39, %v215_v36 }
  0xc9   :  { %v219_v43 = vxor.u32 2147483648, %v218_v41 }
  0xcb   :  { %v220_v44 = vsel %vm137_vm0, %v219_v43, %v218_v41 }
  0xcc   :  { %v223_v48 = vsel %vm136_vm1, %v610_v12, %v220_v44 }
  0xcd   :  { %v519_v47 = vpop.eup %518  ;;  %522 = vcosq.f32 %v223_v48 }
  0xce   :  { %v521_v49 = vpop.eup %520  ;;  %v131_v26 = vxor.u32 2147483648, %v519_v47  ;;  %524 = vsinq.f32 %v223_v48 }
  0xcf   :  { %v128_v50 = vxor.u32 2147483648, %v521_v49 }
  0xd0   :  { %v132_v52 = vsel %vm130_vm2, %v131_v26, %v521_v49  ;;  %v341_v53 = vsel %vm339_vm3, %v131_v26, %v521_v49 }
  0xd1   :  { %v129_v54 = vsel %vm127_vm4, %v519_v47, %v128_v50  ;;  %v338_v19 = vsel %vm336_vm5, %v519_v47, %v128_v50 }
  0xd2   :  { %v133_v55 = vsel %vm126_vm6, %v129_v54, %v132_v52  ;;  %v342_v56 = vsel %vm335_vm7, %v338_v19, %v341_v53 }
  0xd3   :  { %v134_v58 = vsel %vm124_vm8, nan, %v133_v55  ;;  %v343_v59 = vsel %vm124_vm8, nan, %v342_v56 }
  0xd4   :  { %238 = vst [vmem:[#allocation2] sm:$0xff] %v134_v58  ;;  %448 = vst [vmem:[#allocation4] sm:$0xff] %v343_v59 }
  0xd7   :  { %v523_v62 = vpop.eup %522 }
  0xd8   :  { %v525_v63 = vpop.eup %524  ;;  %v234_v0 = vxor.u32 2147483648, %v523_v62 }
  0xd9   :  { %v231_v1 = vxor.u32 2147483648, %v525_v63 }
  0xda   :  { %v235_v4 = vsel %vm233_vm9, %v234_v0, %v525_v63  ;;  %v445_v7 = vsel %vm443_vm10, %v234_v0, %v525_v63 }
  0xdb   :  { %v232_v5 = vsel %vm230_vm11, %v523_v62, %v231_v1  ;;  %v442_v6 = vsel %vm440_vm12, %v523_v62, %v231_v1 }
  0xdc   :  { %v236_v9 = vsel %vm229_vm13, %v232_v5, %v235_v4  ;;  %v446_v10 = vsel %vm439_vm14, %v442_v6, %v445_v7 }
  0xdd   :  { %v237_v11 = vsel %vm227_vm15, nan, %v236_v9  ;;  %v447_v13 = vsel %vm227_vm15, nan, %v446_v10 }
  0xde   :  { %239 = vst [vmem:[#allocation2 + $0x8] sm:$0xff] %v237_v11  ;;  %449 = vst [vmem:[#allocation4 + $0x8] sm:$0xff] %v447_v13 }
  0xdf   :  { %537 = shalt.err (!%p534_p4)
}
  0xe0   :  { %s538_s19 = scalar_lea.hbm %s698_s1, 256 }
  0xe1   :  { %p539_p5 = scmp.ne.s32.totalorder %s698_s1, %s538_s19  ;;  %p542_p6 = scmp.lt.u32.totalorder %s538_s19, %s698_s1 }
  0xe3   :  { %p544_p7 = pnand %p542_p6, %p539_p5 }
  0xe5   :  { %547 = shalt.err (!%p544_p7)
}
  0xe6   :  { %s583_s24 = smov 128   ;;  %s584_s25 = smov 8  }
  0xe7   :  { %461 = dma.vmem_to_hbm [thread:$0]  %s456_s13, 256, %s698_s1, [#allocation3], %s583_s24, %s583_s24, %s584_s25  }
  0xe8   :  { %s548_s28 = scalar_lea.vmem %s666_s15, 256  ;;  %p553_p9 = scmp.lt.s32.totalorder %s666_s15, %s666_s15 }
  0xe9   :  { %p549_p8 = scmp.ne.s32.totalorder %s666_s15, %s548_s28  ;;  %p554_p10 = scmp.lt.s32.totalorder %s548_s28, %s548_s28 }
  0xeb   :  { %p555_p11 = por %p554_p10, %p553_p9 }
  0xed   :  { %p556_p12 = pnand %p555_p11, %p549_p8 }
  0xef   :  { %559 = shalt.err (!%p556_p12)
}
  0xf0   :  { %s560_s3 = scalar_lea.hbm %s699_s2, 256 }
  0xf1   :  { %p561_p13 = scmp.ne.s32.totalorder %s699_s2, %s560_s3  ;;  %p564_p0 = scmp.lt.u32.totalorder %s560_s3, %s699_s2 }
  0xf3   :  { %p566_p1 = pnand %p564_p0, %p561_p13 }
  0xf5   :  { %569 = shalt.err (!%p566_p1)
}
  0xf6   :  { %473 = dma.vmem_to_hbm [thread:$0]  %s666_s15, 256, %s699_s2, [#allocation5], %s583_s24, %s583_s24, %s584_s25  }
  0xf7   :  { %570 = dma.done.wait [#allocation3], 256  }
  0xf8   :  { %571 = vsyncadd [#allocation3], 4294967040 }
  0xf9   :  { %572 = dma.done.wait [#allocation5], 256  }
  0xfa   :  { %573 = vsyncadd [#allocation5], 4294967040 }
  0xfb   :  { %480 = vsyncpa [#allocation3], 1 }
  0xfc   :  { %481 = vsyncpa [#allocation5], 1 }

</bundles_post_ra>
